<compile_context>
chip_gen: v5e
topology: v5e:2x2
jax: 0.10.0
libtpu: 0.0.40
codegen_flags: <defaults>
</compile_context>

<pallas_src>
import numpy as np
import jax
import jax.numpy as jnp
from jax import lax
from jax.experimental import pallas as pl
from jax.experimental.pallas import tpu as pltpu


def _lstm_stack_kernel(x_ref, w_ih_ref, w_hh_ref, b_ref, h_n_ref,
                       seq_ref, gx_ref):
    """Single invocation: all L layers, all T timesteps.

    x_ref    : (T*B, I)   time-major flattened input (row t*B + b)
    w_ih_ref : (L, I, 4H) input->gates weights (pre-transposed)
    w_hh_ref : (L, H, 4H) hidden->gates weights (pre-transposed)
    b_ref    : (L, 1, 4H) b_ih + b_hh per layer
    h_n_ref  : (L, B, H)  output: final hidden state of every layer
    seq_ref  : (T*B, H)   VMEM scratch; layer l's output sequence becomes layer
                          l+1's input (I == H by module constraint)
    gx_ref   : (T*B, 4H)  VMEM scratch; hoisted input projection for one layer
    """
    L = w_ih_ref.shape[0]
    H = w_ih_ref.shape[2] // 4
    TB = seq_ref.shape[0]
    B = h_n_ref.shape[1]
    T = TB // B

    # Layer 0 consumes the external input sequence.
    seq_ref[...] = x_ref[...]

    def layer_body(l, carry):
        w_ih = w_ih_ref[l]                       # (I, 4H)
        w_hh = w_hh_ref[l]                       # (H, 4H)
        b = b_ref[l]                             # (1, 4H)

        # Hoisted input projection: one matmul over the whole sequence.
        gx_ref[...] = jnp.dot(seq_ref[...], w_ih,
                              preferred_element_type=jnp.float32) + b

        # h_0 = c_0 = zeros (the module constructs zero initial states).
        h = jnp.zeros((B, H), jnp.float32)
        c = jnp.zeros((B, H), jnp.float32)

        # Fully unrolled recurrence: static slice offsets, only h @ W_hh is serial.
        for t in range(T):
            gates = gx_ref[pl.ds(t * B, B), :] + jnp.dot(
                h, w_hh, preferred_element_type=jnp.float32)         # (B, 4H)
            # PyTorch gate order: i, f, g, o
            i_g = jax.nn.sigmoid(gates[:, 0 * H:1 * H])
            f_g = jax.nn.sigmoid(gates[:, 1 * H:2 * H])
            g_g = jnp.tanh(gates[:, 2 * H:3 * H])
            o_g = jax.nn.sigmoid(gates[:, 3 * H:4 * H])
            c = f_g * c + i_g * g_g
            h = o_g * jnp.tanh(c)
            seq_ref[pl.ds(t * B, B), :] = h      # becomes next layer's input at t

        h_n_ref[l] = h                           # final hidden state of layer l
        return carry

    lax.fori_loop(0, L, layer_body, 0)


@jax.jit
def lstm_forward(x, params):
    """x: (B, T, I) batch-first f32. Returns (L*B, C) = fc(h_n.view(-1, H))."""
    w_ih_t, w_hh_t, b, w_fc_t, b_fc = params
    L, I, four_h = w_ih_t.shape
    H = four_h // 4
    assert I == H, "module constraint: numInputParams == numHiddenDimensions"
    B, T, _ = x.shape

    # Time-major, flattened to (T*B, I) so the per-layer input projection is one
    # dense 2-D matmul inside the kernel.
    x_flat = jnp.transpose(x, (1, 0, 2)).reshape(T * B, I).astype(jnp.float32)

    h_n = pl.pallas_call(
        _lstm_stack_kernel,
        out_shape=jax.ShapeDtypeStruct((L, B, H), jnp.float32),
        in_specs=[pl.BlockSpec(memory_space=pltpu.MemorySpace.VMEM)] * 4,
        out_specs=pl.BlockSpec(memory_space=pltpu.MemorySpace.VMEM),
        scratch_shapes=[
            pltpu.VMEM((T * B, H), jnp.float32),       # seq buffer (layer I/O)
            pltpu.VMEM((T * B, four_h), jnp.float32),  # hoisted x @ W_ih + b
        ],
    )(x_flat, w_ih_t, w_hh_t, b)

    # fc applied once to all layers' final hidden states: a single dense
    # (L*B, H) x (H, C) matmul, fused with the reshape under jit.
    return h_n.reshape(L * B, H) @ w_fc_t + b_fc


def init_params(key, num_output, num_input, hidden, layers):
    """Deterministic init matching torch.nn.LSTM / nn.Linear parameter shapes."""
    ks = jax.random.split(key, 6)
    std = 1.0 / float(np.sqrt(hidden))
    w_ih = jax.random.uniform(ks[0], (layers, 4 * hidden, num_input),
                              minval=-std, maxval=std)
    w_hh = jax.random.uniform(ks[1], (layers, 4 * hidden, hidden),
                              minval=-std, maxval=std)
    b_ih = jax.random.uniform(ks[2], (layers, 4 * hidden), minval=-std, maxval=std)
    b_hh = jax.random.uniform(ks[3], (layers, 4 * hidden), minval=-std, maxval=std)
    w_fc = jax.random.uniform(ks[4], (num_output, hidden), minval=-std, maxval=std)
    b_fc = jax.random.uniform(ks[5], (num_output,), minval=-std, maxval=std)
    # Kernel-friendly packing (pre-transpose, fold the two LSTM biases).
    w_ih_t = jnp.transpose(w_ih, (0, 2, 1)).astype(jnp.float32)      # (L, I, 4H)
    w_hh_t = jnp.transpose(w_hh, (0, 2, 1)).astype(jnp.float32)      # (L, H, 4H)
    b = (b_ih + b_hh).reshape(layers, 1, 4 * hidden).astype(jnp.float32)
    w_fc_t = jnp.transpose(w_fc).astype(jnp.float32)                 # (H, C)
    b_fc2 = b_fc.reshape(1, num_output).astype(jnp.float32)
    return (w_ih_t, w_hh_t, b, w_fc_t, b_fc2)


def lstm_ref(x, params):
    """Pure-JAX reference of the same forward pass (correctness check)."""
    w_ih_t, w_hh_t, b, w_fc_t, b_fc = params
    L, I, four_h = w_ih_t.shape
    H = four_h // 4
    B, T, _ = x.shape
    seq = jnp.transpose(x, (1, 0, 2)).astype(jnp.float32)  # (T, B, I)
    h_last = []
    for l in range(L):
        h = jnp.zeros((B, H), jnp.float32)
        c = jnp.zeros((B, H), jnp.float32)
        outs = []
        for t in range(T):
            gates = seq[t] @ w_ih_t[l] + h @ w_hh_t[l] + b[l]
            i_g = jax.nn.sigmoid(gates[:, :H])
            f_g = jax.nn.sigmoid(gates[:, H:2 * H])
            g_g = jnp.tanh(gates[:, 2 * H:3 * H])
            o_g = jax.nn.sigmoid(gates[:, 3 * H:])
            c = f_g * c + i_g * g_g
            h = o_g * jnp.tanh(c)
            outs.append(h)
        seq = jnp.stack(outs)
        h_last.append(h)
    h_n = jnp.stack(h_last)                    # (L, B, H)
    return h_n.reshape(-1, H) @ w_fc_t + b_fc  # (L*B, C)


if __name__ == "__main__":
    # Constructor args. The buggy h_0/c_0 construction in the reference module
    # forces numInputParams == numHiddenDimensions == numLayers.
    num_output_types = 8
    num_input_params = 16
    num_hidden_dims = 16
    num_layers = 16
    B, T = 2, 8

    key = jax.random.PRNGKey(0)
    kx, kp = jax.random.split(key)
    x = jax.random.normal(kx, (B, T, num_input_params), dtype=jnp.float32)
    params = init_params(kp, num_output_types, num_input_params,
                         num_hidden_dims, num_layers)

    out = jax.block_until_ready(lstm_forward(x, params))
    assert out.shape == (num_layers * B, num_output_types), out.shape

    ref = lstm_ref(x, params)
    np.testing.assert_allclose(np.asarray(out), np.asarray(ref),
                               atol=1e-4, rtol=1e-4)
    print("KERNEL_OK")
</pallas_src>

<mosaic_0001>
module attributes {stable_mosaic.version = 11 : i64} {
  func.func @_lstm_stack_kernel(%arg0: memref<16x16xf32, #tpu.memory_space<vmem>>, %arg1: memref<16x16x64xf32, #tpu.memory_space<vmem>>, %arg2: memref<16x16x64xf32, #tpu.memory_space<vmem>>, %arg3: memref<16x1x64xf32, #tpu.memory_space<vmem>>, %arg4: memref<16x2x16xf32, #tpu.memory_space<vmem>>, %arg5: memref<16x16xf32, #tpu.memory_space<vmem>>, %arg6: memref<16x64xf32, #tpu.memory_space<vmem>>) attributes {dimension_semantics = [], scalar_prefetch = 0 : i64, scratch_operands = 2 : i64, tpu.core_type = #tpu.core_type<tc>} {
    %c0 = arith.constant 0 : index
    %c0_0 = arith.constant 0 : index
    %0 = vector.load %arg0[%c0, %c0_0] : memref<16x16xf32, #tpu.memory_space<vmem>>, vector<16x16xf32>
    %c0_1 = arith.constant 0 : index
    %c0_2 = arith.constant 0 : index
    %1 = vector.load %arg5[%c0_1, %c0_2] : memref<16x16xf32, #tpu.memory_space<vmem>>, vector<16x16xf32>
    tpu.vector_store %arg5[%c0_1, %c0_2], %0 {strides = array<i32>} : memref<16x16xf32, #tpu.memory_space<vmem>>, vector<16x16xf32>,
    %c0_i32 = arith.constant 0 : i32
    %c16_i32 = arith.constant 16 : i32
    %2 = arith.addi %c0_i32, %c16_i32 : i32
    %c1_i32 = arith.constant 1 : i32
    scf.for %arg7 = %c0_i32 to %2 step %c1_i32  : i32 {
      %3 = arith.index_cast %arg7 : i32 to index
      %c0_4 = arith.constant 0 : index
      %c0_5 = arith.constant 0 : index
      %4 = vector.load %arg1[%3, %c0_4, %c0_5] : memref<16x16x64xf32, #tpu.memory_space<vmem>>, vector<1x16x64xf32>
      %5 = vector.shape_cast %4 : vector<1x16x64xf32> to vector<16x64xf32>
      %6 = arith.index_cast %arg7 : i32 to index
      %c0_6 = arith.constant 0 : index
      %c0_7 = arith.constant 0 : index
      %7 = vector.load %arg2[%6, %c0_6, %c0_7] : memref<16x16x64xf32, #tpu.memory_space<vmem>>, vector<1x16x64xf32>
      %8 = vector.shape_cast %7 : vector<1x16x64xf32> to vector<16x64xf32>
      %9 = arith.index_cast %arg7 : i32 to index
      %c0_8 = arith.constant 0 : index
      %c0_9 = arith.constant 0 : index
      %10 = vector.load %arg3[%9, %c0_8, %c0_9] : memref<16x1x64xf32, #tpu.memory_space<vmem>>, vector<1x1x64xf32>
      %11 = vector.shape_cast %10 : vector<1x1x64xf32> to vector<1x64xf32>
      %c0_10 = arith.constant 0 : index
      %c0_11 = arith.constant 0 : index
      %12 = vector.load %arg5[%c0_10, %c0_11] : memref<16x16xf32, #tpu.memory_space<vmem>>, vector<16x16xf32>
      %cst = arith.constant dense<0.000000e+00> : vector<16x64xf32>
      %13 = tpu.matmul %12, %5, %cst {dimension_numbers = #tpu.dot_dimension_numbers<[1], [0], [0], [1], [0, 0, 1, 1], [], []>} : vector<16x16xf32>, vector<16x64xf32>, vector<16x64xf32> -> vector<16x64xf32>
      %14 = vector.broadcast %11 : vector<1x64xf32> to vector<16x64xf32>
      %15 = arith.addf %13, %14 : vector<16x64xf32>
      %c0_12 = arith.constant 0 : index
      %c0_13 = arith.constant 0 : index
      %16 = vector.load %arg6[%c0_12, %c0_13] : memref<16x64xf32, #tpu.memory_space<vmem>>, vector<16x64xf32>
      tpu.vector_store %arg6[%c0_12, %c0_13], %15 {strides = array<i32>} : memref<16x64xf32, #tpu.memory_space<vmem>>, vector<16x64xf32>,
      %cst_14 = arith.constant 0.000000e+00 : f32
      %17 = vector.broadcast %cst_14 : f32 to vector<2x16xf32>
      %cst_15 = arith.constant 0.000000e+00 : f32
      %18 = vector.broadcast %cst_15 : f32 to vector<2x16xf32>
      %c0_16 = arith.constant 0 : index
      %c0_17 = arith.constant 0 : index
      %19 = vector.load %arg6[%c0_16, %c0_17] : memref<16x64xf32, #tpu.memory_space<vmem>>, vector<2x64xf32>
      %cst_18 = arith.constant dense<0.000000e+00> : vector<2x64xf32>
      %20 = tpu.matmul %17, %8, %cst_18 {dimension_numbers = #tpu.dot_dimension_numbers<[1], [0], [0], [1], [0, 0, 1, 1], [], []>} : vector<2x16xf32>, vector<16x64xf32>, vector<2x64xf32> -> vector<2x64xf32>
      %21 = arith.addf %19, %20 : vector<2x64xf32>
      %22 = vector.extract_strided_slice %21 {offsets = [0, 0], sizes = [2, 16], strides = [1, 1]} : vector<2x64xf32> to vector<2x16xf32>
      %23 = arith.negf %22 : vector<2x16xf32>
      %24 = math.exp %23 : vector<2x16xf32>
      %cst_19 = arith.constant 1.000000e+00 : f32
      %25 = vector.broadcast %cst_19 : f32 to vector<2x16xf32>
      %26 = arith.addf %25, %24 : vector<2x16xf32>
      %27 = arith.divf %25, %26 : vector<2x16xf32>
      %28 = vector.extract_strided_slice %21 {offsets = [0, 16], sizes = [2, 16], strides = [1, 1]} : vector<2x64xf32> to vector<2x16xf32>
      %29 = arith.negf %28 : vector<2x16xf32>
      %30 = math.exp %29 : vector<2x16xf32>
      %cst_20 = arith.constant 1.000000e+00 : f32
      %31 = vector.broadcast %cst_20 : f32 to vector<2x16xf32>
      %32 = arith.addf %31, %30 : vector<2x16xf32>
      %33 = arith.divf %31, %32 : vector<2x16xf32>
      %34 = vector.extract_strided_slice %21 {offsets = [0, 32], sizes = [2, 16], strides = [1, 1]} : vector<2x64xf32> to vector<2x16xf32>
      %35 = math.tanh %34 : vector<2x16xf32>
      %36 = vector.extract_strided_slice %21 {offsets = [0, 48], sizes = [2, 16], strides = [1, 1]} : vector<2x64xf32> to vector<2x16xf32>
      %37 = arith.negf %36 : vector<2x16xf32>
      %38 = math.exp %37 : vector<2x16xf32>
      %cst_21 = arith.constant 1.000000e+00 : f32
      %39 = vector.broadcast %cst_21 : f32 to vector<2x16xf32>
      %40 = arith.addf %39, %38 : vector<2x16xf32>
      %41 = arith.divf %39, %40 : vector<2x16xf32>
      %42 = arith.mulf %33, %18 : vector<2x16xf32>
      %43 = arith.mulf %27, %35 : vector<2x16xf32>
      %44 = arith.addf %42, %43 : vector<2x16xf32>
      %45 = math.tanh %44 : vector<2x16xf32>
      %46 = arith.mulf %41, %45 : vector<2x16xf32>
      %c0_22 = arith.constant 0 : index
      %c0_23 = arith.constant 0 : index
      %47 = vector.load %arg5[%c0_22, %c0_23] : memref<16x16xf32, #tpu.memory_space<vmem>>, vector<2x16xf32>
      tpu.vector_store %arg5[%c0_22, %c0_23], %46 {strides = array<i32>} : memref<16x16xf32, #tpu.memory_space<vmem>>, vector<2x16xf32>,
      %c2 = arith.constant 2 : index
      %c0_24 = arith.constant 0 : index
      %48 = vector.load %arg6[%c2, %c0_24] : memref<16x64xf32, #tpu.memory_space<vmem>>, vector<2x64xf32>
      %cst_25 = arith.constant dense<0.000000e+00> : vector<2x64xf32>
      %49 = tpu.matmul %46, %8, %cst_25 {dimension_numbers = #tpu.dot_dimension_numbers<[1], [0], [0], [1], [0, 0, 1, 1], [], []>} : vector<2x16xf32>, vector<16x64xf32>, vector<2x64xf32> -> vector<2x64xf32>
      %50 = arith.addf %48, %49 : vector<2x64xf32>
      %51 = vector.extract_strided_slice %50 {offsets = [0, 0], sizes = [2, 16], strides = [1, 1]} : vector<2x64xf32> to vector<2x16xf32>
      %52 = arith.negf %51 : vector<2x16xf32>
      %53 = math.exp %52 : vector<2x16xf32>
      %cst_26 = arith.constant 1.000000e+00 : f32
      %54 = vector.broadcast %cst_26 : f32 to vector<2x16xf32>
      %55 = arith.addf %54, %53 : vector<2x16xf32>
      %56 = arith.divf %54, %55 : vector<2x16xf32>
      %57 = vector.extract_strided_slice %50 {offsets = [0, 16], sizes = [2, 16], strides = [1, 1]} : vector<2x64xf32> to vector<2x16xf32>
      %58 = arith.negf %57 : vector<2x16xf32>
      %59 = math.exp %58 : vector<2x16xf32>
      %cst_27 = arith.constant 1.000000e+00 : f32
      %60 = vector.broadcast %cst_27 : f32 to vector<2x16xf32>
      %61 = arith.addf %60, %59 : vector<2x16xf32>
      %62 = arith.divf %60, %61 : vector<2x16xf32>
      %63 = vector.extract_strided_slice %50 {offsets = [0, 32], sizes = [2, 16], strides = [1, 1]} : vector<2x64xf32> to vector<2x16xf32>
      %64 = math.tanh %63 : vector<2x16xf32>
      %65 = vector.extract_strided_slice %50 {offsets = [0, 48], sizes = [2, 16], strides = [1, 1]} : vector<2x64xf32> to vector<2x16xf32>
      %66 = arith.negf %65 : vector<2x16xf32>
      %67 = math.exp %66 : vector<2x16xf32>
      %cst_28 = arith.constant 1.000000e+00 : f32
      %68 = vector.broadcast %cst_28 : f32 to vector<2x16xf32>
      %69 = arith.addf %68, %67 : vector<2x16xf32>
      %70 = arith.divf %68, %69 : vector<2x16xf32>
      %71 = arith.mulf %62, %44 : vector<2x16xf32>
      %72 = arith.mulf %56, %64 : vector<2x16xf32>
      %73 = arith.addf %71, %72 : vector<2x16xf32>
      %74 = math.tanh %73 : vector<2x16xf32>
      %75 = arith.mulf %70, %74 : vector<2x16xf32>
      %c2_29 = arith.constant 2 : index
      %c0_30 = arith.constant 0 : index
      %76 = vector.load %arg5[%c2_29, %c0_30] : memref<16x16xf32, #tpu.memory_space<vmem>>, vector<2x16xf32>
      tpu.vector_store %arg5[%c2_29, %c0_30], %75 {strides = array<i32>} : memref<16x16xf32, #tpu.memory_space<vmem>>, vector<2x16xf32>,
      %c4 = arith.constant 4 : index
      %c0_31 = arith.constant 0 : index
      %77 = vector.load %arg6[%c4, %c0_31] : memref<16x64xf32, #tpu.memory_space<vmem>>, vector<2x64xf32>
      %cst_32 = arith.constant dense<0.000000e+00> : vector<2x64xf32>
      %78 = tpu.matmul %75, %8, %cst_32 {dimension_numbers = #tpu.dot_dimension_numbers<[1], [0], [0], [1], [0, 0, 1, 1], [], []>} : vector<2x16xf32>, vector<16x64xf32>, vector<2x64xf32> -> vector<2x64xf32>
      %79 = arith.addf %77, %78 : vector<2x64xf32>
      %80 = vector.extract_strided_slice %79 {offsets = [0, 0], sizes = [2, 16], strides = [1, 1]} : vector<2x64xf32> to vector<2x16xf32>
      %81 = arith.negf %80 : vector<2x16xf32>
      %82 = math.exp %81 : vector<2x16xf32>
      %cst_33 = arith.constant 1.000000e+00 : f32
      %83 = vector.broadcast %cst_33 : f32 to vector<2x16xf32>
      %84 = arith.addf %83, %82 : vector<2x16xf32>
      %85 = arith.divf %83, %84 : vector<2x16xf32>
      %86 = vector.extract_strided_slice %79 {offsets = [0, 16], sizes = [2, 16], strides = [1, 1]} : vector<2x64xf32> to vector<2x16xf32>
      %87 = arith.negf %86 : vector<2x16xf32>
      %88 = math.exp %87 : vector<2x16xf32>
      %cst_34 = arith.constant 1.000000e+00 : f32
      %89 = vector.broadcast %cst_34 : f32 to vector<2x16xf32>
      %90 = arith.addf %89, %88 : vector<2x16xf32>
      %91 = arith.divf %89, %90 : vector<2x16xf32>
      %92 = vector.extract_strided_slice %79 {offsets = [0, 32], sizes = [2, 16], strides = [1, 1]} : vector<2x64xf32> to vector<2x16xf32>
      %93 = math.tanh %92 : vector<2x16xf32>
      %94 = vector.extract_strided_slice %79 {offsets = [0, 48], sizes = [2, 16], strides = [1, 1]} : vector<2x64xf32> to vector<2x16xf32>
      %95 = arith.negf %94 : vector<2x16xf32>
      %96 = math.exp %95 : vector<2x16xf32>
      %cst_35 = arith.constant 1.000000e+00 : f32
      %97 = vector.broadcast %cst_35 : f32 to vector<2x16xf32>
      %98 = arith.addf %97, %96 : vector<2x16xf32>
      %99 = arith.divf %97, %98 : vector<2x16xf32>
      %100 = arith.mulf %91, %73 : vector<2x16xf32>
      %101 = arith.mulf %85, %93 : vector<2x16xf32>
      %102 = arith.addf %100, %101 : vector<2x16xf32>
      %103 = math.tanh %102 : vector<2x16xf32>
      %104 = arith.mulf %99, %103 : vector<2x16xf32>
      %c4_36 = arith.constant 4 : index
      %c0_37 = arith.constant 0 : index
      %105 = vector.load %arg5[%c4_36, %c0_37] : memref<16x16xf32, #tpu.memory_space<vmem>>, vector<2x16xf32>
      tpu.vector_store %arg5[%c4_36, %c0_37], %104 {strides = array<i32>} : memref<16x16xf32, #tpu.memory_space<vmem>>, vector<2x16xf32>,
      %c6 = arith.constant 6 : index
      %c0_38 = arith.constant 0 : index
      %106 = vector.load %arg6[%c6, %c0_38] : memref<16x64xf32, #tpu.memory_space<vmem>>, vector<2x64xf32>
      %cst_39 = arith.constant dense<0.000000e+00> : vector<2x64xf32>
      %107 = tpu.matmul %104, %8, %cst_39 {dimension_numbers = #tpu.dot_dimension_numbers<[1], [0], [0], [1], [0, 0, 1, 1], [], []>} : vector<2x16xf32>, vector<16x64xf32>, vector<2x64xf32> -> vector<2x64xf32>
      %108 = arith.addf %106, %107 : vector<2x64xf32>
      %109 = vector.extract_strided_slice %108 {offsets = [0, 0], sizes = [2, 16], strides = [1, 1]} : vector<2x64xf32> to vector<2x16xf32>
      %110 = arith.negf %109 : vector<2x16xf32>
      %111 = math.exp %110 : vector<2x16xf32>
      %cst_40 = arith.constant 1.000000e+00 : f32
      %112 = vector.broadcast %cst_40 : f32 to vector<2x16xf32>
      %113 = arith.addf %112, %111 : vector<2x16xf32>
      %114 = arith.divf %112, %113 : vector<2x16xf32>
      %115 = vector.extract_strided_slice %108 {offsets = [0, 16], sizes = [2, 16], strides = [1, 1]} : vector<2x64xf32> to vector<2x16xf32>
      %116 = arith.negf %115 : vector<2x16xf32>
      %117 = math.exp %116 : vector<2x16xf32>
      %cst_41 = arith.constant 1.000000e+00 : f32
      %118 = vector.broadcast %cst_41 : f32 to vector<2x16xf32>
      %119 = arith.addf %118, %117 : vector<2x16xf32>
      %120 = arith.divf %118, %119 : vector<2x16xf32>
      %121 = vector.extract_strided_slice %108 {offsets = [0, 32], sizes = [2, 16], strides = [1, 1]} : vector<2x64xf32> to vector<2x16xf32>
      %122 = math.tanh %121 : vector<2x16xf32>
      %123 = vector.extract_strided_slice %108 {offsets = [0, 48], sizes = [2, 16], strides = [1, 1]} : vector<2x64xf32> to vector<2x16xf32>
      %124 = arith.negf %123 : vector<2x16xf32>
      %125 = math.exp %124 : vector<2x16xf32>
      %cst_42 = arith.constant 1.000000e+00 : f32
      %126 = vector.broadcast %cst_42 : f32 to vector<2x16xf32>
      %127 = arith.addf %126, %125 : vector<2x16xf32>
      %128 = arith.divf %126, %127 : vector<2x16xf32>
      %129 = arith.mulf %120, %102 : vector<2x16xf32>
      %130 = arith.mulf %114, %122 : vector<2x16xf32>
      %131 = arith.addf %129, %130 : vector<2x16xf32>
      %132 = math.tanh %131 : vector<2x16xf32>
      %133 = arith.mulf %128, %132 : vector<2x16xf32>
      %c6_43 = arith.constant 6 : index
      %c0_44 = arith.constant 0 : index
      %134 = vector.load %arg5[%c6_43, %c0_44] : memref<16x16xf32, #tpu.memory_space<vmem>>, vector<2x16xf32>
      tpu.vector_store %arg5[%c6_43, %c0_44], %133 {strides = array<i32>} : memref<16x16xf32, #tpu.memory_space<vmem>>, vector<2x16xf32>,
      %c8 = arith.constant 8 : index
      %c0_45 = arith.constant 0 : index
      %135 = vector.load %arg6[%c8, %c0_45] : memref<16x64xf32, #tpu.memory_space<vmem>>, vector<2x64xf32>
      %cst_46 = arith.constant dense<0.000000e+00> : vector<2x64xf32>
      %136 = tpu.matmul %133, %8, %cst_46 {dimension_numbers = #tpu.dot_dimension_numbers<[1], [0], [0], [1], [0, 0, 1, 1], [], []>} : vector<2x16xf32>, vector<16x64xf32>, vector<2x64xf32> -> vector<2x64xf32>
      %137 = arith.addf %135, %136 : vector<2x64xf32>
      %138 = vector.extract_strided_slice %137 {offsets = [0, 0], sizes = [2, 16], strides = [1, 1]} : vector<2x64xf32> to vector<2x16xf32>
      %139 = arith.negf %138 : vector<2x16xf32>
      %140 = math.exp %139 : vector<2x16xf32>
      %cst_47 = arith.constant 1.000000e+00 : f32
      %141 = vector.broadcast %cst_47 : f32 to vector<2x16xf32>
      %142 = arith.addf %141, %140 : vector<2x16xf32>
      %143 = arith.divf %141, %142 : vector<2x16xf32>
      %144 = vector.extract_strided_slice %137 {offsets = [0, 16], sizes = [2, 16], strides = [1, 1]} : vector<2x64xf32> to vector<2x16xf32>
      %145 = arith.negf %144 : vector<2x16xf32>
      %146 = math.exp %145 : vector<2x16xf32>
      %cst_48 = arith.constant 1.000000e+00 : f32
      %147 = vector.broadcast %cst_48 : f32 to vector<2x16xf32>
      %148 = arith.addf %147, %146 : vector<2x16xf32>
      %149 = arith.divf %147, %148 : vector<2x16xf32>
      %150 = vector.extract_strided_slice %137 {offsets = [0, 32], sizes = [2, 16], strides = [1, 1]} : vector<2x64xf32> to vector<2x16xf32>
      %151 = math.tanh %150 : vector<2x16xf32>
      %152 = vector.extract_strided_slice %137 {offsets = [0, 48], sizes = [2, 16], strides = [1, 1]} : vector<2x64xf32> to vector<2x16xf32>
      %153 = arith.negf %152 : vector<2x16xf32>
      %154 = math.exp %153 : vector<2x16xf32>
      %cst_49 = arith.constant 1.000000e+00 : f32
      %155 = vector.broadcast %cst_49 : f32 to vector<2x16xf32>
      %156 = arith.addf %155, %154 : vector<2x16xf32>
      %157 = arith.divf %155, %156 : vector<2x16xf32>
      %158 = arith.mulf %149, %131 : vector<2x16xf32>
      %159 = arith.mulf %143, %151 : vector<2x16xf32>
      %160 = arith.addf %158, %159 : vector<2x16xf32>
      %161 = math.tanh %160 : vector<2x16xf32>
      %162 = arith.mulf %157, %161 : vector<2x16xf32>
      %c8_50 = arith.constant 8 : index
      %c0_51 = arith.constant 0 : index
      %163 = vector.load %arg5[%c8_50, %c0_51] : memref<16x16xf32, #tpu.memory_space<vmem>>, vector<2x16xf32>
      tpu.vector_store %arg5[%c8_50, %c0_51], %162 {strides = array<i32>} : memref<16x16xf32, #tpu.memory_space<vmem>>, vector<2x16xf32>,
      %c10 = arith.constant 10 : index
      %c0_52 = arith.constant 0 : index
      %164 = vector.load %arg6[%c10, %c0_52] : memref<16x64xf32, #tpu.memory_space<vmem>>, vector<2x64xf32>
      %cst_53 = arith.constant dense<0.000000e+00> : vector<2x64xf32>
      %165 = tpu.matmul %162, %8, %cst_53 {dimension_numbers = #tpu.dot_dimension_numbers<[1], [0], [0], [1], [0, 0, 1, 1], [], []>} : vector<2x16xf32>, vector<16x64xf32>, vector<2x64xf32> -> vector<2x64xf32>
      %166 = arith.addf %164, %165 : vector<2x64xf32>
      %167 = vector.extract_strided_slice %166 {offsets = [0, 0], sizes = [2, 16], strides = [1, 1]} : vector<2x64xf32> to vector<2x16xf32>
      %168 = arith.negf %167 : vector<2x16xf32>
      %169 = math.exp %168 : vector<2x16xf32>
      %cst_54 = arith.constant 1.000000e+00 : f32
      %170 = vector.broadcast %cst_54 : f32 to vector<2x16xf32>
      %171 = arith.addf %170, %169 : vector<2x16xf32>
      %172 = arith.divf %170, %171 : vector<2x16xf32>
      %173 = vector.extract_strided_slice %166 {offsets = [0, 16], sizes = [2, 16], strides = [1, 1]} : vector<2x64xf32> to vector<2x16xf32>
      %174 = arith.negf %173 : vector<2x16xf32>
      %175 = math.exp %174 : vector<2x16xf32>
      %cst_55 = arith.constant 1.000000e+00 : f32
      %176 = vector.broadcast %cst_55 : f32 to vector<2x16xf32>
      %177 = arith.addf %176, %175 : vector<2x16xf32>
      %178 = arith.divf %176, %177 : vector<2x16xf32>
      %179 = vector.extract_strided_slice %166 {offsets = [0, 32], sizes = [2, 16], strides = [1, 1]} : vector<2x64xf32> to vector<2x16xf32>
      %180 = math.tanh %179 : vector<2x16xf32>
      %181 = vector.extract_strided_slice %166 {offsets = [0, 48], sizes = [2, 16], strides = [1, 1]} : vector<2x64xf32> to vector<2x16xf32>
      %182 = arith.negf %181 : vector<2x16xf32>
      %183 = math.exp %182 : vector<2x16xf32>
      %cst_56 = arith.constant 1.000000e+00 : f32
      %184 = vector.broadcast %cst_56 : f32 to vector<2x16xf32>
      %185 = arith.addf %184, %183 : vector<2x16xf32>
      %186 = arith.divf %184, %185 : vector<2x16xf32>
      %187 = arith.mulf %178, %160 : vector<2x16xf32>
      %188 = arith.mulf %172, %180 : vector<2x16xf32>
      %189 = arith.addf %187, %188 : vector<2x16xf32>
      %190 = math.tanh %189 : vector<2x16xf32>
      %191 = arith.mulf %186, %190 : vector<2x16xf32>
      %c10_57 = arith.constant 10 : index
      %c0_58 = arith.constant 0 : index
      %192 = vector.load %arg5[%c10_57, %c0_58] : memref<16x16xf32, #tpu.memory_space<vmem>>, vector<2x16xf32>
      tpu.vector_store %arg5[%c10_57, %c0_58], %191 {strides = array<i32>} : memref<16x16xf32, #tpu.memory_space<vmem>>, vector<2x16xf32>,
      %c12 = arith.constant 12 : index
      %c0_59 = arith.constant 0 : index
      %193 = vector.load %arg6[%c12, %c0_59] : memref<16x64xf32, #tpu.memory_space<vmem>>, vector<2x64xf32>
      %cst_60 = arith.constant dense<0.000000e+00> : vector<2x64xf32>
      %194 = tpu.matmul %191, %8, %cst_60 {dimension_numbers = #tpu.dot_dimension_numbers<[1], [0], [0], [1], [0, 0, 1, 1], [], []>} : vector<2x16xf32>, vector<16x64xf32>, vector<2x64xf32> -> vector<2x64xf32>
      %195 = arith.addf %193, %194 : vector<2x64xf32>
      %196 = vector.extract_strided_slice %195 {offsets = [0, 0], sizes = [2, 16], strides = [1, 1]} : vector<2x64xf32> to vector<2x16xf32>
      %197 = arith.negf %196 : vector<2x16xf32>
      %198 = math.exp %197 : vector<2x16xf32>
      %cst_61 = arith.constant 1.000000e+00 : f32
      %199 = vector.broadcast %cst_61 : f32 to vector<2x16xf32>
      %200 = arith.addf %199, %198 : vector<2x16xf32>
      %201 = arith.divf %199, %200 : vector<2x16xf32>
      %202 = vector.extract_strided_slice %195 {offsets = [0, 16], sizes = [2, 16], strides = [1, 1]} : vector<2x64xf32> to vector<2x16xf32>
      %203 = arith.negf %202 : vector<2x16xf32>
      %204 = math.exp %203 : vector<2x16xf32>
      %cst_62 = arith.constant 1.000000e+00 : f32
      %205 = vector.broadcast %cst_62 : f32 to vector<2x16xf32>
      %206 = arith.addf %205, %204 : vector<2x16xf32>
      %207 = arith.divf %205, %206 : vector<2x16xf32>
      %208 = vector.extract_strided_slice %195 {offsets = [0, 32], sizes = [2, 16], strides = [1, 1]} : vector<2x64xf32> to vector<2x16xf32>
      %209 = math.tanh %208 : vector<2x16xf32>
      %210 = vector.extract_strided_slice %195 {offsets = [0, 48], sizes = [2, 16], strides = [1, 1]} : vector<2x64xf32> to vector<2x16xf32>
      %211 = arith.negf %210 : vector<2x16xf32>
      %212 = math.exp %211 : vector<2x16xf32>
      %cst_63 = arith.constant 1.000000e+00 : f32
      %213 = vector.broadcast %cst_63 : f32 to vector<2x16xf32>
      %214 = arith.addf %213, %212 : vector<2x16xf32>
      %215 = arith.divf %213, %214 : vector<2x16xf32>
      %216 = arith.mulf %207, %189 : vector<2x16xf32>
      %217 = arith.mulf %201, %209 : vector<2x16xf32>
      %218 = arith.addf %216, %217 : vector<2x16xf32>
      %219 = math.tanh %218 : vector<2x16xf32>
      %220 = arith.mulf %215, %219 : vector<2x16xf32>
      %c12_64 = arith.constant 12 : index
      %c0_65 = arith.constant 0 : index
      %221 = vector.load %arg5[%c12_64, %c0_65] : memref<16x16xf32, #tpu.memory_space<vmem>>, vector<2x16xf32>
      tpu.vector_store %arg5[%c12_64, %c0_65], %220 {strides = array<i32>} : memref<16x16xf32, #tpu.memory_space<vmem>>, vector<2x16xf32>,
      %c14 = arith.constant 14 : index
      %c0_66 = arith.constant 0 : index
      %222 = vector.load %arg6[%c14, %c0_66] : memref<16x64xf32, #tpu.memory_space<vmem>>, vector<2x64xf32>
      %cst_67 = arith.constant dense<0.000000e+00> : vector<2x64xf32>
      %223 = tpu.matmul %220, %8, %cst_67 {dimension_numbers = #tpu.dot_dimension_numbers<[1], [0], [0], [1], [0, 0, 1, 1], [], []>} : vector<2x16xf32>, vector<16x64xf32>, vector<2x64xf32> -> vector<2x64xf32>
      %224 = arith.addf %222, %223 : vector<2x64xf32>
      %225 = vector.extract_strided_slice %224 {offsets = [0, 0], sizes = [2, 16], strides = [1, 1]} : vector<2x64xf32> to vector<2x16xf32>
      %226 = arith.negf %225 : vector<2x16xf32>
      %227 = math.exp %226 : vector<2x16xf32>
      %cst_68 = arith.constant 1.000000e+00 : f32
      %228 = vector.broadcast %cst_68 : f32 to vector<2x16xf32>
      %229 = arith.addf %228, %227 : vector<2x16xf32>
      %230 = arith.divf %228, %229 : vector<2x16xf32>
      %231 = vector.extract_strided_slice %224 {offsets = [0, 16], sizes = [2, 16], strides = [1, 1]} : vector<2x64xf32> to vector<2x16xf32>
      %232 = arith.negf %231 : vector<2x16xf32>
      %233 = math.exp %232 : vector<2x16xf32>
      %cst_69 = arith.constant 1.000000e+00 : f32
      %234 = vector.broadcast %cst_69 : f32 to vector<2x16xf32>
      %235 = arith.addf %234, %233 : vector<2x16xf32>
      %236 = arith.divf %234, %235 : vector<2x16xf32>
      %237 = vector.extract_strided_slice %224 {offsets = [0, 32], sizes = [2, 16], strides = [1, 1]} : vector<2x64xf32> to vector<2x16xf32>
      %238 = math.tanh %237 : vector<2x16xf32>
      %239 = vector.extract_strided_slice %224 {offsets = [0, 48], sizes = [2, 16], strides = [1, 1]} : vector<2x64xf32> to vector<2x16xf32>
      %240 = arith.negf %239 : vector<2x16xf32>
      %241 = math.exp %240 : vector<2x16xf32>
      %cst_70 = arith.constant 1.000000e+00 : f32
      %242 = vector.broadcast %cst_70 : f32 to vector<2x16xf32>
      %243 = arith.addf %242, %241 : vector<2x16xf32>
      %244 = arith.divf %242, %243 : vector<2x16xf32>
      %245 = arith.mulf %236, %218 : vector<2x16xf32>
      %246 = arith.mulf %230, %238 : vector<2x16xf32>
      %247 = arith.addf %245, %246 : vector<2x16xf32>
      %248 = math.tanh %247 : vector<2x16xf32>
      %249 = arith.mulf %244, %248 : vector<2x16xf32>
      %c14_71 = arith.constant 14 : index
      %c0_72 = arith.constant 0 : index
      %250 = vector.load %arg5[%c14_71, %c0_72] : memref<16x16xf32, #tpu.memory_space<vmem>>, vector<2x16xf32>
      tpu.vector_store %arg5[%c14_71, %c0_72], %249 {strides = array<i32>} : memref<16x16xf32, #tpu.memory_space<vmem>>, vector<2x16xf32>,
      %251 = arith.index_cast %arg7 : i32 to index
      %c0_73 = arith.constant 0 : index
      %c0_74 = arith.constant 0 : index
      %252 = vector.load %arg4[%251, %c0_73, %c0_74] : memref<16x2x16xf32, #tpu.memory_space<vmem>>, vector<1x2x16xf32>
      %253 = vector.shape_cast %252 : vector<1x2x16xf32> to vector<2x16xf32>
      %254 = vector.shape_cast %249 : vector<2x16xf32> to vector<1x2x16xf32>
      tpu.vector_store %arg4[%251, %c0_73, %c0_74], %254 {strides = array<i32>} : memref<16x2x16xf32, #tpu.memory_space<vmem>>, vector<1x2x16xf32>,
    }
    %c16_i32_3 = arith.constant 16 : i32
    return
  }
}

</mosaic_0001>

<bundles_post_ra>
// kernel: lstm_forward.1
= control target key start
LH: loop header
LB: loop body
LE: loop exit
PB: predicated region body
PF: predicated region fallthrough
CT: control target
= control target key end

     0   :  { %9 = vsyncpa [#allocation5], 0  ;;  %s939_s0 = inlined_call_operand.vmem [shape: f32[16,16], index: 0, kind: input, shape index: {}]   ;;  %s940_s1 = inlined_call_operand.hbm [shape: f32[16,16,64], index: 1, kind: input, shape index: {}]   ;;  %s941_s2 = inlined_call_operand.hbm [shape: f32[16,16,64], index: 2, kind: input, shape index: {}]   ;;  %s942_s3 = inlined_call_operand.vmem [shape: f32[16,1,64], index: 3, kind: input, shape index: {}]   ;;  %s943_s4 = inlined_call_operand.vmem [shape: f32[16,2,16], index: 4, kind: output, shape index: {}]  }
   0x1   :  { %s17_s17 = sshll.u32 %s940_s1, 4  ;;  %s18_s17 = int_to_ptr.hbm [resolvable:$true] %s17_s17 }
   0x2   :  { %10 = vsyncpa [#allocation7], 0  ;;  %s818_s18 = smov [#allocation4]   ;;  %s30_s22 = sshll.u32 %s941_s2, 4  ;;  %s31_s22 = int_to_ptr.hbm [resolvable:$true] %s30_s22 }
   0x3   :  { %s19_s19 = sshll.u32 %s818_s18, 4  ;;  %s819_s23 = smov 128   ;;  %s20_s19 = int_to_ptr.vmem [resolvable:$true] %s19_s19 }
   0x4   :  { %s820_s24 = smov 8   ;;  %s821_s25 = smov [#allocation6]  }
   0x5   :  { %25 = dma.hbm_to_vmem [thread:$0]  %s18_s17, 4096, %s20_s19, [#allocation5], %s819_s23, %s819_s23, %s820_s24  }
   0x6   :  { %s32_s26 = sshll.u32 %s821_s25, 4  ;;  %s33_s26 = int_to_ptr.vmem [resolvable:$true] %s32_s26 }
   0x7   :  { %38 = dma.hbm_to_vmem [thread:$0]  %s31_s22, 4096, %s33_s26, [#allocation7], %s819_s23, %s819_s23, %s820_s24  }
   0x8   :  { %810 = dma.done.wait [#allocation5], 4096  }
   0x9   :  { %811 = vsyncadd [#allocation5], 4294963200 }
   0xa   :  { %812 = dma.done.wait [#allocation7], 4096  }
   0xb   :  { %813 = vsyncadd [#allocation7], 4294963200  ;;  %vm51_vm0 = vcmask 130048   ;;  %v49_v0 = vld [vmem:[%s939_s0] sm:$0xff]  ;;  %v50_v1 = vld [vmem:[%s939_s0 + $0x8] sm:$0xff]  ;;  %s866_s2 = smov 0  }
   0xc   :  { %52 = vst.msk [vmem:[#allocation2] sm:$0xff] %vm51_vm0, %v49_v0 }
   0xd   :  { %53 = vst.msk [vmem:[#allocation2 + $0x8] sm:$0xff] %vm51_vm0, %v50_v1 }
   0xe LB: > { %s657_s30 = sshll.u32 %s816_s2, 4  ;;  %s67_s7 = scalar_lea.vmem %s942_s3, %s816_s2  ;;  %v822_v7 = vmov 0.0   ;;  %vm103_vm1 = vcmask 523264   ;;  %vm172_vm6 = vcmask 123904   ;;  %s816_s2 = sphi %s866_s2, %s59_s2  }
   0xf   : > { %s61_s8 = scalar_lea.vmem [#allocation4], %s657_s30  ;;  %s64_s0 = scalar_lea.vmem [#allocation6], %s657_s30  ;;  %v877_v8 = vld [vmem:[%s67_s7] ss:$0 sm:$0xff] }
  0x10   : > { %v63_v2 = vld [vmem:[%s61_s8 + $0x8] sm:$0xff]  ;;  %v65_v3 = vld [vmem:[%s64_s0] sm:$0xff]  ;;  %s823_s9 = smov 96   ;;  %s824_s10 = smov 16  }
  0x11   : > { %v66_v4 = vld [vmem:[%s64_s0 + $0x8] sm:$0xff]  ;;  %94 = vmatpush.msra.mxu0 %v63_v2  ;;  %v62_v5 = vld [vmem:[%s61_s8] sm:$0xff]  ;;  %s825_s11 = smov 32   ;;  %s826_s12 = smov 80  }
  0x12   : > { %124 = vmatpush.msra.mxu1 %v66_v4  ;;  %191 = vmatpush.msra.mxu2 %v66_v4  ;;  %s675_s13 = sshll.u32 %s816_s2, 1  ;;  %s59_s2 = sadd.s32 1, %s816_s2  }
  0x13   : > { %v69_v6 = vld [vmem:[#allocation2] sm:$0xff]  ;;  %257 = vmatpush.msra.mxu3 %v66_v4  ;;  %95 = vmatpush.msra.mxu0 %v62_v5  ;;  %s637_s16 = scalar_lea.vmem %s943_s4, %s675_s13  ;;  %p56_p0 = scmp.ge.s32.totalorder %s59_s2, 16  }
  0x14   : > { %125 = vmatpush.msra.mxu1 %v65_v3  ;;  %658 = vmatmul.msk.f32.vlgmr.msra.gmra.mxu0 %vm51_vm0, %v69_v6 }
  0x15   : > { %126 = vmatmul.f32.vlgmr.msra.gmra.mxu1 %v822_v7  ;;  %192 = vmatpush.msra.mxu2 %v65_v3 }
  0x16   : > { %258 = vmatpush.msra.mxu3 %v65_v3  ;;  %323 = vmatpush.msrb.mxu1 %v66_v4 }
  0x17   : > { %389 = vmatpush.msrb.mxu2 %v66_v4  ;;  %521 = vmatpush.msrb.mxu0 %v66_v4 }
  0x18   : > { %455 = vmatpush.msrb.mxu3 %v66_v4  ;;  %324 = vmatpush.msrb.mxu1 %v65_v3 }
  0x19   : > { %390 = vmatpush.msrb.mxu2 %v65_v3  ;;  %522 = vmatpush.msrb.mxu0 %v65_v3 }
  0x1a   : > { %456 = vmatpush.msrb.mxu3 %v65_v3  ;;  %587 = vmatpush.msra.mxu1 %v66_v4 }
  0x1c   : > { %588 = vmatpush.msra.mxu1 %v65_v3 }
  0x91   : > { %v97_v9 = vpop.f32.mrf.mxu0 }
  0x92   : > { %v98_v10 = vadd.f32 %v877_v8, %v97_v9  ;;  %v127_v11 = vpop.f32.mrf.mxu1 }
  0x94   : > { %104 = vst.msk [vmem:[#allocation3] sm:$0xff] %vm103_vm1, %v98_v10 }
  0x9b   : > { %v106_v12 = vld [vmem:[#allocation3] sm:$0x3]  ;;  %v174_v37 = vld [vmem:[#allocation3 + $0x2] sm:$0x3]  ;;  %v240_v63 = vld [vmem:[#allocation3 + $0x4] sm:$0x3] }
  0x9c   : > { %v130_v13 = vadd.f32 %v127_v11, %v106_v12 }
  0x9e   : > { %694 = vtanh.f32 %v130_v13  ;;  %v660_v15 = vmul.f32 -1.442695, %v130_v13 }
  0xa0   : > { %696 = vpow2.f32 %v660_v15 }
  0xa4   : > { %v695_v14 = vpop.eup %694 }
  0xa5   : > { %153 = vrot.lane.b32.xlu0 %v695_v14, %s823_s9 }
  0xa6   : > { %v697_v16 = vpop.eup %696 }
  0xa7   : > { %v134_v17 = vadd.f32 1.0, %v697_v16 }
  0xa9   : > { %698 = vrcp.f32 %v134_v17  ;;  %v146_v23 = vand.u32 2147483648, %v134_v17  ;;  %vm140_vm3 = vweird.f32 %v134_v17  ;;  %v144_v24 = vand.u32 2147483647, %v134_v17 }
  0xab   : > { %v147_v26 = vor.u32 1.1754944e-38, %v146_v23  ;;  %vm145_vm5 = vcmp.eq.f32.partialorder %v144_v24, 8.507059e+37 }
  0xaf   : > { %v699_v18 = vpop.eup %698 }
  0xb0   : > { %v136_v19 = vmul.f32 %v699_v18, %v134_v17  ;;  %vm141_vm2 = vweird.f32 %v699_v18 }
  0xb1   : > { %vm142_vm4 = vmor %vm140_vm3, %vm141_vm2 }
  0xb2   : > { %v137_v20 = vsub.f32 1.0, %v136_v19 }
  0xb4   : > { %v138_v21 = vmul.f32 %v699_v18, %v137_v20 }
  0xb6   : > { %v139_v22 = vadd.f32 %v699_v18, %v138_v21 }
  0xb8   : > { %v143_v25 = vsel %vm142_vm4, %v699_v18, %v139_v22 }
  0xb9   : > { %v148_v28 = vsel %vm145_vm5, %v147_v26, %v143_v25  ;;  %v306_v26 = vld [vmem:[#allocation3 + $0x6] sm:$0x3] }
  0xba   : > { %v151_v30 = vmul.f32 0.0, %v148_v28 }
 0x117   : > { %v154_v27 = vpop.permute.xlu0 %153 }
 0x118   : > { %v156_v29 = vmul.f32 %v154_v27, %v148_v28 }
 0x11a   : > { %158 = vrot.lane.b32.xlu0 %v156_v29, %s824_s10 }
 0x18c   : > { %v159_v31 = vpop.permute.xlu0 %158 }
 0x18d   : > { %v161_v32 = vadd.f32 %v159_v31, %v151_v30 }
 0x18f   : > { %700 = vtanh.f32 %v161_v32 }
 0x195   : > { %v701_v33 = vpop.eup %700 }
 0x196   : > { %164 = vrot.lane.b32.xlu1 %v701_v33, %s825_s11 }
 0x208   : > { %v165_v34 = vpop.permute.xlu1 %164 }
 0x209   : > { %v167_v35 = vmul.f32 %v165_v34, %v148_v28 }
 0x20b   : > { %169 = vrot.lane.b32.xlu1 %v167_v35, %s826_s12 }
 0x27d   : > { %v170_v36 = vpop.permute.xlu1 %169 }
 0x27e   : > { %173 = vst.msk [vmem:[#allocation2] sm:$0x3] %vm172_vm6, %v170_v36  ;;  %661 = vmatmul.msk.f32.vlgmr.msra.gmra.mxu2 %vm51_vm0, %v170_v36 }
 0x301   : > { %v194_v38 = vpop.f32.mrf.mxu2 }
 0x302   : > { %v197_v39 = vadd.f32 %v194_v38, %v174_v37 }
 0x304   : > { %702 = vtanh.f32 %v197_v39  ;;  %v662_v41 = vmul.f32 -1.442695, %v197_v39 }
 0x306   : > { %704 = vpow2.f32 %v662_v41 }
 0x30a   : > { %v703_v40 = vpop.eup %702 }
 0x30b   : > { %220 = vrot.lane.b32.xlu2 %v703_v40, %s823_s9 }
 0x30c   : > { %v705_v42 = vpop.eup %704 }
 0x30d   : > { %v201_v43 = vadd.f32 1.0, %v705_v42 }
 0x30f   : > { %706 = vrcp.f32 %v201_v43  ;;  %v213_v49 = vand.u32 2147483648, %v201_v43  ;;  %vm207_vm8 = vweird.f32 %v201_v43  ;;  %v211_v50 = vand.u32 2147483647, %v201_v43 }
 0x311   : > { %v214_v52 = vor.u32 1.1754944e-38, %v213_v49  ;;  %vm212_vm10 = vcmp.eq.f32.partialorder %v211_v50, 8.507059e+37  ;;  %v70_v49 = vld [vmem:[#allocation2 + $0x8] sm:$0xff] }
 0x312   : > { %659 = vmatmul.msk.f32.gmra.mxu0 %vm51_vm0, %v70_v49 }
 0x315   : > { %v707_v44 = vpop.eup %706 }
 0x316   : > { %v203_v45 = vmul.f32 %v707_v44, %v201_v43  ;;  %vm208_vm7 = vweird.f32 %v707_v44 }
 0x317   : > { %vm209_vm9 = vmor %vm207_vm8, %vm208_vm7 }
 0x318   : > { %v204_v46 = vsub.f32 1.0, %v203_v45 }
 0x31a   : > { %v205_v47 = vmul.f32 %v707_v44, %v204_v46 }
 0x31c   : > { %v206_v48 = vadd.f32 %v707_v44, %v205_v47 }
 0x31e   : > { %v210_v51 = vsel %vm209_vm9, %v707_v44, %v206_v48 }
 0x31f   : > { %v215_v54 = vsel %vm212_vm10, %v214_v52, %v210_v51 }
 0x320   : > { %v218_v56 = vmul.f32 %v215_v54, %v161_v32 }
 0x365   : > { %v221_v53 = vpop.permute.xlu2 %220 }
 0x366   : > { %v223_v55 = vmul.f32 %v221_v53, %v215_v54 }
 0x368   : > { %225 = vrot.lane.b32.xlu2 %v223_v55, %s824_s10 }
 0x38f   : > { %v100_v52 = vpop.f32.mrf.mxu0 }
 0x390   : > { %v101_v53 = vadd.f32 %v877_v8, %v100_v52 }
 0x392   : > { %105 = vst.msk [vmem:[#allocation3 + $0x8] sm:$0xff] %vm103_vm1, %v101_v53 }
 0x399   : > { %v372_v55 = vld [vmem:[#allocation3 + $0x8] sm:$0x3] }
 0x3c2   : > { %v226_v57 = vpop.permute.xlu2 %225 }
 0x3c3   : > { %v228_v58 = vadd.f32 %v226_v57, %v218_v56 }
 0x3c5   : > { %708 = vtanh.f32 %v228_v58 }
 0x3cb   : > { %v709_v59 = vpop.eup %708 }
 0x3cc   : > { %231 = vrot.lane.b32.xlu0 %v709_v59, %s825_s11 }
 0x43e   : > { %v232_v60 = vpop.permute.xlu0 %231 }
 0x43f   : > { %v234_v61 = vmul.f32 %v232_v60, %v215_v54 }
 0x441   : > { %236 = vrot.lane.b32.xlu1 %v234_v61, %s826_s12 }
 0x4b3   : > { %v237_v62 = vpop.permute.xlu1 %236 }
 0x4b4   : > { %239 = vst.msk [vmem:[#allocation2 + $0x2] sm:$0x3] %vm172_vm6, %v237_v62  ;;  %663 = vmatmul.msk.f32.vlgmr.msra.gmra.mxu3 %vm51_vm0, %v237_v62 }
 0x537   : > { %v260_v0 = vpop.f32.mrf.mxu3 }
 0x538   : > { %v263_v1 = vadd.f32 %v260_v0, %v240_v63 }
 0x53a   : > { %710 = vtanh.f32 %v263_v1  ;;  %v664_v3 = vmul.f32 -1.442695, %v263_v1 }
 0x53c   : > { %712 = vpow2.f32 %v664_v3 }
 0x540   : > { %v711_v2 = vpop.eup %710 }
 0x541   : > { %286 = vrot.lane.b32.xlu2 %v711_v2, %s823_s9 }
 0x542   : > { %v713_v4 = vpop.eup %712 }
 0x543   : > { %v267_v5 = vadd.f32 1.0, %v713_v4 }
 0x545   : > { %714 = vrcp.f32 %v267_v5  ;;  %v279_v12 = vand.u32 2147483648, %v267_v5  ;;  %vm273_vm12 = vweird.f32 %v267_v5  ;;  %v277_v13 = vand.u32 2147483647, %v267_v5 }
 0x547   : > { %v280_v15 = vor.u32 1.1754944e-38, %v279_v12  ;;  %vm278_vm14 = vcmp.eq.f32.partialorder %v277_v13, 8.507059e+37 }
 0x54b   : > { %v715_v6 = vpop.eup %714 }
 0x54c   : > { %v269_v7 = vmul.f32 %v715_v6, %v267_v5  ;;  %vm274_vm11 = vweird.f32 %v715_v6 }
 0x54d   : > { %vm275_vm13 = vmor %vm273_vm12, %vm274_vm11 }
 0x54e   : > { %v270_v9 = vsub.f32 1.0, %v269_v7 }
 0x550   : > { %v271_v10 = vmul.f32 %v715_v6, %v270_v9 }
 0x552   : > { %v272_v11 = vadd.f32 %v715_v6, %v271_v10 }
 0x554   : > { %v276_v14 = vsel %vm275_vm13, %v715_v6, %v272_v11 }
 0x555   : > { %v281_v17 = vsel %vm278_vm14, %v280_v15, %v276_v14 }
 0x556   : > { %v284_v19 = vmul.f32 %v281_v17, %v228_v58 }
 0x59b   : > { %v287_v16 = vpop.permute.xlu2 %286 }
 0x59c   : > { %v289_v18 = vmul.f32 %v287_v16, %v281_v17 }
 0x59e   : > { %291 = vrot.lane.b32.xlu0 %v289_v18, %s824_s10 }
 0x610   : > { %v292_v20 = vpop.permute.xlu0 %291 }
 0x611   : > { %v294_v21 = vadd.f32 %v292_v20, %v284_v19 }
 0x613   : > { %716 = vtanh.f32 %v294_v21 }
 0x619   : > { %v717_v22 = vpop.eup %716 }
 0x61a   : > { %297 = vrot.lane.b32.xlu1 %v717_v22, %s825_s11 }
 0x68c   : > { %v298_v23 = vpop.permute.xlu1 %297 }
 0x68d   : > { %v300_v24 = vmul.f32 %v298_v23, %v281_v17  ;;  %v438_v17 = vld [vmem:[#allocation3 + $0xa] sm:$0x3] }
 0x68f   : > { %302 = vrot.lane.b32.xlu2 %v300_v24, %s826_s12 }
 0x6e9   : > { %v303_v25 = vpop.permute.xlu2 %302 }
 0x6ea   : > { %305 = vst.msk [vmem:[#allocation2 + $0x4] sm:$0x3] %vm172_vm6, %v303_v25  ;;  %665 = vmatmul.msk.f32.vlgmr.msrb.gmra.mxu1 %vm51_vm0, %v303_v25 }
 0x767   : > { %v326_v27 = vpop.f32.mrf.mxu1 }
 0x768   : > { %v329_v28 = vadd.f32 %v326_v27, %v306_v26 }
 0x76a   : > { %718 = vtanh.f32 %v329_v28  ;;  %v666_v30 = vmul.f32 -1.442695, %v329_v28 }
 0x76c   : > { %720 = vpow2.f32 %v666_v30 }
 0x770   : > { %v719_v29 = vpop.eup %718 }
 0x771   : > { %352 = vrot.lane.b32.xlu0 %v719_v29, %s823_s9 }
 0x772   : > { %v721_v31 = vpop.eup %720 }
 0x773   : > { %v333_v32 = vadd.f32 1.0, %v721_v31 }
 0x775   : > { %722 = vrcp.f32 %v333_v32  ;;  %v345_v38 = vand.u32 2147483648, %v333_v32  ;;  %vm339_vm2 = vweird.f32 %v333_v32  ;;  %v343_v39 = vand.u32 2147483647, %v333_v32 }
 0x777   : > { %v346_v41 = vor.u32 1.1754944e-38, %v345_v38  ;;  %vm344_vm4 = vcmp.eq.f32.partialorder %v343_v39, 8.507059e+37 }
 0x77b   : > { %v723_v33 = vpop.eup %722 }
 0x77c   : > { %v335_v34 = vmul.f32 %v723_v33, %v333_v32  ;;  %vm340_vm15 = vweird.f32 %v723_v33 }
 0x77d   : > { %vm341_vm3 = vmor %vm339_vm2, %vm340_vm15 }
 0x77e   : > { %v336_v35 = vsub.f32 1.0, %v335_v34 }
 0x780   : > { %v337_v36 = vmul.f32 %v723_v33, %v336_v35 }
 0x782   : > { %v338_v37 = vadd.f32 %v723_v33, %v337_v36 }
 0x784   : > { %v342_v40 = vsel %vm341_vm3, %v723_v33, %v338_v37 }
 0x785   : > { %v347_v43 = vsel %vm344_vm4, %v346_v41, %v342_v40 }
 0x786   : > { %v350_v45 = vmul.f32 %v347_v43, %v294_v21 }
 0x7e3   : > { %v353_v42 = vpop.permute.xlu0 %352 }
 0x7e4   : > { %v355_v44 = vmul.f32 %v353_v42, %v347_v43 }
 0x7e6   : > { %357 = vrot.lane.b32.xlu1 %v355_v44, %s824_s10 }
 0x858   : > { %v358_v46 = vpop.permute.xlu1 %357 }
 0x859   : > { %v360_v47 = vadd.f32 %v358_v46, %v350_v45 }
 0x85b   : > { %724 = vtanh.f32 %v360_v47 }
 0x861   : > { %v725_v48 = vpop.eup %724 }
 0x862   : > { %363 = vrot.lane.b32.xlu2 %v725_v48, %s825_s11 }
 0x8bc   : > { %v364_v50 = vpop.permute.xlu2 %363 }
 0x8bd   : > { %v366_v51 = vmul.f32 %v364_v50, %v347_v43  ;;  %v504_v43 = vld [vmem:[#allocation3 + $0xc] sm:$0x3] }
 0x8bf   : > { %368 = vrot.lane.b32.xlu0 %v366_v51, %s826_s12 }
 0x931   : > { %v369_v54 = vpop.permute.xlu0 %368 }
 0x932   : > { %371 = vst.msk [vmem:[#allocation2 + $0x6] sm:$0x3] %vm172_vm6, %v369_v54  ;;  %667 = vmatmul.msk.f32.vlgmr.msrb.gmra.mxu2 %vm51_vm0, %v369_v54 }
 0x9b5   : > { %v392_v56 = vpop.f32.mrf.mxu2 }
 0x9b6   : > { %v395_v57 = vadd.f32 %v392_v56, %v372_v55 }
 0x9b8   : > { %726 = vtanh.f32 %v395_v57  ;;  %v668_v59 = vmul.f32 -1.442695, %v395_v57 }
 0x9ba   : > { %728 = vpow2.f32 %v668_v59 }
 0x9be   : > { %v727_v58 = vpop.eup %726 }
 0x9bf   : > { %418 = vrot.lane.b32.xlu1 %v727_v58, %s823_s9 }
 0x9c0   : > { %v729_v60 = vpop.eup %728 }
 0x9c1   : > { %v399_v61 = vadd.f32 1.0, %v729_v60 }
 0x9c3   : > { %730 = vrcp.f32 %v399_v61  ;;  %v411_v2 = vand.u32 2147483648, %v399_v61  ;;  %vm405_vm5 = vweird.f32 %v399_v61  ;;  %v409_v3 = vand.u32 2147483647, %v399_v61 }
 0x9c5   : > { %v412_v5 = vor.u32 1.1754944e-38, %v411_v2  ;;  %vm410_vm8 = vcmp.eq.f32.partialorder %v409_v3, 8.507059e+37 }
 0x9c9   : > { %v731_v8 = vpop.eup %730 }
 0x9ca   : > { %v401_v62 = vmul.f32 %v731_v8, %v399_v61  ;;  %vm406_vm1 = vweird.f32 %v731_v8 }
 0x9cb   : > { %vm407_vm7 = vmor %vm405_vm5, %vm406_vm1 }
 0x9cc   : > { %v402_v63 = vsub.f32 1.0, %v401_v62 }
 0x9ce   : > { %v403_v0 = vmul.f32 %v731_v8, %v402_v63 }
 0x9d0   : > { %v404_v1 = vadd.f32 %v731_v8, %v403_v0 }
 0x9d2   : > { %v408_v4 = vsel %vm407_vm7, %v731_v8, %v404_v1 }
 0x9d3   : > { %v413_v7 = vsel %vm410_vm8, %v412_v5, %v408_v4  ;;  %v570_v4 = vld [vmem:[#allocation3 + $0xe] sm:$0x3] }
 0x9d4   : > { %v416_v10 = vmul.f32 %v413_v7, %v360_v47 }
 0xa31   : > { %v419_v6 = vpop.permute.xlu1 %418 }
 0xa32   : > { %v421_v9 = vmul.f32 %v419_v6, %v413_v7 }
 0xa34   : > { %423 = vrot.lane.b32.xlu2 %v421_v9, %s824_s10 }
 0xa8e   : > { %v424_v11 = vpop.permute.xlu2 %423 }
 0xa8f   : > { %v426_v12 = vadd.f32 %v424_v11, %v416_v10 }
 0xa91   : > { %732 = vtanh.f32 %v426_v12 }
 0xa97   : > { %v733_v13 = vpop.eup %732 }
 0xa98   : > { %429 = vrot.lane.b32.xlu0 %v733_v13, %s825_s11 }
 0xb0a   : > { %v430_v14 = vpop.permute.xlu0 %429 }
 0xb0b   : > { %v432_v15 = vmul.f32 %v430_v14, %v413_v7 }
 0xb0d   : > { %434 = vrot.lane.b32.xlu1 %v432_v15, %s826_s12 }
 0xb7f   : > { %v435_v16 = vpop.permute.xlu1 %434 }
 0xb80   : > { %437 = vst.msk [vmem:[#allocation2 + $0x8] sm:$0x3] %vm172_vm6, %v435_v16  ;;  %669 = vmatmul.msk.f32.vlgmr.msrb.gmra.mxu3 %vm51_vm0, %v435_v16 }
 0xc03   : > { %v458_v18 = vpop.f32.mrf.mxu3 }
 0xc04   : > { %v461_v19 = vadd.f32 %v458_v18, %v438_v17 }
 0xc06   : > { %734 = vtanh.f32 %v461_v19  ;;  %v670_v21 = vmul.f32 -1.442695, %v461_v19 }
 0xc08   : > { %736 = vpow2.f32 %v670_v21 }
 0xc0c   : > { %v735_v20 = vpop.eup %734 }
 0xc0d   : > { %484 = vrot.lane.b32.xlu2 %v735_v20, %s823_s9 }
 0xc0e   : > { %v737_v22 = vpop.eup %736 }
 0xc0f   : > { %v465_v23 = vadd.f32 1.0, %v737_v22 }
 0xc11   : > { %738 = vrcp.f32 %v465_v23  ;;  %v477_v29 = vand.u32 2147483648, %v465_v23  ;;  %vm471_vm10 = vweird.f32 %v465_v23  ;;  %v475_v30 = vand.u32 2147483647, %v465_v23 }
 0xc13   : > { %v478_v32 = vor.u32 1.1754944e-38, %v477_v29  ;;  %vm476_vm12 = vcmp.eq.f32.partialorder %v475_v30, 8.507059e+37 }
 0xc17   : > { %v739_v24 = vpop.eup %738 }
 0xc18   : > { %v467_v25 = vmul.f32 %v739_v24, %v465_v23  ;;  %vm472_vm9 = vweird.f32 %v739_v24 }
 0xc19   : > { %vm473_vm11 = vmor %vm471_vm10, %vm472_vm9 }
 0xc1a   : > { %v468_v26 = vsub.f32 1.0, %v467_v25 }
 0xc1c   : > { %v469_v27 = vmul.f32 %v739_v24, %v468_v26 }
 0xc1e   : > { %v470_v28 = vadd.f32 %v739_v24, %v469_v27 }
 0xc20   : > { %v474_v31 = vsel %vm473_vm11, %v739_v24, %v470_v28 }
 0xc21   : > { %v479_v34 = vsel %vm476_vm12, %v478_v32, %v474_v31 }
 0xc22   : > { %v482_v36 = vmul.f32 %v479_v34, %v426_v12 }
 0xc67   : > { %v485_v33 = vpop.permute.xlu2 %484 }
 0xc68   : > { %v487_v35 = vmul.f32 %v485_v33, %v479_v34 }
 0xc6a   : > { %489 = vrot.lane.b32.xlu0 %v487_v35, %s824_s10 }
 0xcdc   : > { %v490_v37 = vpop.permute.xlu0 %489 }
 0xcdd   : > { %v492_v38 = vadd.f32 %v490_v37, %v482_v36 }
 0xcdf   : > { %740 = vtanh.f32 %v492_v38 }
 0xce5   : > { %v741_v39 = vpop.eup %740 }
 0xce6   : > { %495 = vrot.lane.b32.xlu1 %v741_v39, %s825_s11 }
 0xd58   : > { %v496_v40 = vpop.permute.xlu1 %495 }
 0xd59   : > { %v498_v41 = vmul.f32 %v496_v40, %v479_v34 }
 0xd5b   : > { %500 = vrot.lane.b32.xlu2 %v498_v41, %s826_s12 }
 0xdb5   : > { %v501_v42 = vpop.permute.xlu2 %500 }
 0xdb6   : > { %503 = vst.msk [vmem:[#allocation2 + $0xa] sm:$0x3] %vm172_vm6, %v501_v42  ;;  %671 = vmatmul.msk.f32.vlgmr.msrb.gmra.mxu0 %vm51_vm0, %v501_v42 }
 0xe33   : > { %v524_v44 = vpop.f32.mrf.mxu0 }
 0xe34   : > { %v527_v45 = vadd.f32 %v524_v44, %v504_v43 }
 0xe36   : > { %742 = vtanh.f32 %v527_v45  ;;  %v672_v47 = vmul.f32 -1.442695, %v527_v45 }
 0xe38   : > { %744 = vpow2.f32 %v672_v47 }
 0xe3c   : > { %v743_v46 = vpop.eup %742 }
 0xe3d   : > { %550 = vrot.lane.b32.xlu0 %v743_v46, %s823_s9 }
 0xe3e   : > { %v745_v48 = vpop.eup %744 }
 0xe3f   : > { %v531_v49 = vadd.f32 1.0, %v745_v48 }
 0xe41   : > { %746 = vrcp.f32 %v531_v49  ;;  %v543_v55 = vand.u32 2147483648, %v531_v49  ;;  %vm537_vm14 = vweird.f32 %v531_v49  ;;  %v541_v56 = vand.u32 2147483647, %v531_v49 }
 0xe43   : > { %v544_v58 = vor.u32 1.1754944e-38, %v543_v55  ;;  %vm542_vm2 = vcmp.eq.f32.partialorder %v541_v56, 8.507059e+37 }
 0xe47   : > { %v747_v50 = vpop.eup %746 }
 0xe48   : > { %v533_v51 = vmul.f32 %v747_v50, %v531_v49  ;;  %vm538_vm13 = vweird.f32 %v747_v50 }
 0xe49   : > { %vm539_vm15 = vmor %vm537_vm14, %vm538_vm13 }
 0xe4a   : > { %v534_v52 = vsub.f32 1.0, %v533_v51 }
 0xe4c   : > { %v535_v53 = vmul.f32 %v747_v50, %v534_v52 }
 0xe4e   : > { %v536_v54 = vadd.f32 %v747_v50, %v535_v53 }
 0xe50   : > { %v540_v57 = vsel %vm539_vm15, %v747_v50, %v536_v54 }
 0xe51   : > { %v545_v60 = vsel %vm542_vm2, %v544_v58, %v540_v57 }
 0xe52   : > { %v548_v8 = vmul.f32 %v545_v60, %v492_v38 }
 0xeaf   : > { %v551_v59 = vpop.permute.xlu0 %550 }
 0xeb0   : > { %v553_v61 = vmul.f32 %v551_v59, %v545_v60 }
 0xeb2   : > { %555 = vrot.lane.b32.xlu1 %v553_v61, %s824_s10 }
 0xf24   : > { %v556_v62 = vpop.permute.xlu1 %555 }
 0xf25   : > { %v558_v63 = vadd.f32 %v556_v62, %v548_v8 }
 0xf27   : > { %748 = vtanh.f32 %v558_v63 }
 0xf2d   : > { %v749_v0 = vpop.eup %748 }
 0xf2e   : > { %561 = vrot.lane.b32.xlu2 %v749_v0, %s825_s11 }
 0xf88   : > { %v562_v1 = vpop.permute.xlu2 %561 }
 0xf89   : > { %v564_v2 = vmul.f32 %v562_v1, %v545_v60 }
 0xf8b   : > { %566 = vrot.lane.b32.xlu0 %v564_v2, %s826_s12 }
 0xffd   : > { %v567_v3 = vpop.permute.xlu0 %566 }
 0xffe   : > { %569 = vst.msk [vmem:[#allocation2 + $0xc] sm:$0x3] %vm172_vm6, %v567_v3  ;;  %673 = vmatmul.msk.f32.vlgmr.msra.gmra.mxu1 %vm51_vm0, %v567_v3 }
0x107b   : > { %v590_v5 = vpop.f32.mrf.mxu1 }
0x107c   : > { %v593_v6 = vadd.f32 %v590_v5, %v570_v4 }
0x107e   : > { %750 = vtanh.f32 %v593_v6  ;;  %v674_v9 = vmul.f32 -1.442695, %v593_v6 }
0x1080   : > { %752 = vpow2.f32 %v674_v9 }
0x1084   : > { %v751_v7 = vpop.eup %750 }
0x1085   : > { %616 = vrot.lane.b32.xlu1 %v751_v7, %s823_s9 }
0x1086   : > { %v753_v10 = vpop.eup %752 }
0x1087   : > { %v597_v11 = vadd.f32 1.0, %v753_v10 }
0x1089   : > { %754 = vrcp.f32 %v597_v11  ;;  %v609_v17 = vand.u32 2147483648, %v597_v11  ;;  %vm603_vm4 = vweird.f32 %v597_v11  ;;  %v607_v18 = vand.u32 2147483647, %v597_v11 }
0x108b   : > { %v610_v20 = vor.u32 1.1754944e-38, %v609_v17  ;;  %vm608_vm5 = vcmp.eq.f32.partialorder %v607_v18, 8.507059e+37 }
0x108f   : > { %v755_v12 = vpop.eup %754 }
0x1090   : > { %v599_v13 = vmul.f32 %v755_v12, %v597_v11  ;;  %vm604_vm3 = vweird.f32 %v755_v12 }
0x1091   : > { %vm605_vm1 = vmor %vm603_vm4, %vm604_vm3 }
0x1092   : > { %v600_v14 = vsub.f32 1.0, %v599_v13 }
0x1094   : > { %v601_v15 = vmul.f32 %v755_v12, %v600_v14 }
0x1096   : > { %v602_v16 = vadd.f32 %v755_v12, %v601_v15 }
0x1098   : > { %v606_v19 = vsel %vm605_vm1, %v755_v12, %v602_v16 }
0x1099   : > { %v611_v22 = vsel %vm608_vm5, %v610_v20, %v606_v19 }
0x109a   : > { %v614_v24 = vmul.f32 %v611_v22, %v558_v63 }
0x10f7   : > { %v617_v21 = vpop.permute.xlu1 %616 }
0x10f8   : > { %v619_v23 = vmul.f32 %v617_v21, %v611_v22 }
0x10fa   : > { %621 = vrot.lane.b32.xlu2 %v619_v23, %s824_s10 }
0x1154   : > { %v622_v25 = vpop.permute.xlu2 %621 }
0x1155   : > { %v624_v26 = vadd.f32 %v622_v25, %v614_v24 }
0x1157   : > { %756 = vtanh.f32 %v624_v26 }
0x115d   : > { %v757_v27 = vpop.eup %756 }
0x115e   : > { %627 = vrot.lane.b32.xlu0 %v757_v27, %s825_s11 }
0x11d0   : > { %v628_v28 = vpop.permute.xlu0 %627 }
0x11d1   : > { %v630_v29 = vmul.f32 %v628_v28, %v611_v22 }
0x11d3   : > { %632 = vrot.lane.b32.xlu1 %v630_v29, %s826_s12 }
0x1243   :  { %58 = sbr.rel (!%p56_p0) target bundleno = 14 (0xe), region = 55 }
0x1245   : > { %v633_v30 = vpop.permute.xlu1 %632 }
0x1246   : > { %635 = vst.msk [vmem:[#allocation2 + $0xe] sm:$0x3] %vm172_vm6, %v633_v30 }
0x1247   : > { %638 = vst.msk [vmem:[%s637_s16] sm:$0x3] %vm172_vm6, %v633_v30 }
0x1248   :  { %643 = vsyncpa [#allocation5], 1 }
0x1249   :  { %644 = vsyncpa [#allocation7], 1 }

</bundles_post_ra>
